<compile_context>
chip_gen: v7x
topology: tpu7x:2x2x1
jax: 0.10.0
libtpu: 0.0.40
codegen_flags: <defaults>
</compile_context>

<pallas_src>
import jax
import jax.numpy as jnp
from jax.experimental import pallas as pl
from jax.experimental.pallas import tpu as pltpu

FILTERS = 32       # `filters` in Node.__init__
NODE_INDEX = 1     # num_branch_ops = node_index + 1 = 2 -> len(input_list) == 2
KERNEL = 5         # 'conv5' candidate: kernel=5, dilation=1 -> pad = (0, 4)
T = 128
B = 2


def _node_kernel(x_ref, skip_ref, wf_ref, b_ref, o_ref, slab, xstk):
    # x_ref:    (B, C, T)      input_list[-1]  (main-op input, also a skip edge)
    # skip_ref: (B, C, T)      input_list[0]   (identity skip edge)
    # wf_ref:   (C, K*C) bf16  folded conv weights: wf[co, k*C + ci] = W[k, co, ci]
    # b_ref:    (C, 1)   f32   conv bias
    # o_ref:    (B, C, T)
    # slab:     (C, B*T) f32   VMEM scratch: batches side-by-side on the lane axis
    # xstk:     (K*C, B*T) bf16 VMEM scratch: tap-stacked matmul operand
    nb, c, t = x_ref.shape
    n = nb * t
    k_taps = wf_ref.shape[1] // c

    # 1) Put the two batches side-by-side on the lane axis (aligned stores).
    for b in range(nb):                                   # static, unrolled (B=2)
        slab[:, b * t:(b + 1) * t] = x_ref[b]
    xf = slab[...]                                        # (C, B*T) f32

    # 2) Tap-stacked operand via XLU rolls + mask-selects (lane-aligned stores
    #    only).  Row block k holds the input shifted left by k within each
    #    batch's T-wide lane block, zero-filled at the tail — exactly the
    #    ConstantPad1d((0, K-1)) right-pad semantics.  Rolling the whole
    #    (C, B*T) slab wraps data across batch blocks, but those lanes are
    #    precisely the ones the mask zeroes out.
    lane_in_block = jax.lax.broadcasted_iota(jnp.int32, (c, n), 1) % t
    xstk[0:c, :] = xf.astype(xstk.dtype)                  # tap 0: no shift
    for k in range(1, k_taps):                            # static, unrolled (K-1=4)
        shifted = pltpu.roll(xf, shift=n - k, axis=1)     # == left shift by k
        shifted = jnp.where(lane_in_block < t - k, shifted, 0.0)
        xstk[k * c:(k + 1) * c, :] = shifted.astype(xstk.dtype)

    # 3) Single fused MXU matmul, bf16 operands, f32 accumulation:
    #    (C, K*C) x (K*C, B*T) -> (C, B*T)
    acc = jnp.dot(wf_ref[...], xstk[...], preferred_element_type=jnp.float32)
    acc = acc + b_ref[...]                                # (C, 1) broadcasts over lanes
    conv = jnp.maximum(acc, 0.0)                          # ReLU (dropout_rate=0 -> no-op)

    # 4) Sum of edges: conv + identity(input_list[0]) + identity(input_list[-1])
    for b in range(nb):                                   # static, unrolled
        o_ref[b] = (conv[:, b * t:(b + 1) * t]
                    + x_ref[b] + skip_ref[b]).astype(o_ref.dtype)


def node_forward(input_list, weight, bias):
    """input_list: list of (B, C, T) arrays, len == NODE_INDEX + 1."""
    assert len(input_list) == NODE_INDEX + 1, \
        "Branch op and input list have different lengths"
    x = input_list[-1]
    skip0 = input_list[0]
    b_, c, t_ = x.shape
    k = weight.shape[0]
    # Shape assumptions baked into the kernel (lane-dense T, packed sublanes).
    assert t_ % 128 == 0, "T must be a multiple of 128 (lane width)"
    assert c % 16 == 0, "C must be a multiple of 16 for bf16 sublane packing"
    assert k - 1 < t_, "kernel right-pad must fit within one time block"

    # One-time parameter prep (tiny, host side): fold the K taps into the
    # contraction dim and cast to bf16 for native MXU operands.
    # wf[co, k*C_in + ci] = weight[k, co, ci]
    w_folded = jnp.transpose(weight, (1, 0, 2)).reshape(c, k * c).astype(jnp.bfloat16)

    return pl.pallas_call(
        _node_kernel,
        out_shape=jax.ShapeDtypeStruct((b_, c, t_), x.dtype),
        scratch_shapes=[
            pltpu.VMEM((c, b_ * t_), jnp.float32),        # batches side-by-side
            pltpu.VMEM((k * c, b_ * t_), jnp.bfloat16),   # tap-stacked operand
        ],
    )(x, skip0, w_folded, bias)


def node_ref(input_list, weight, bias, operand_dtype=jnp.float32):
    """Pure-JAX reference of the same fixed architecture.

    operand_dtype lets us also build a bf16-operand reference matching the
    kernel's MXU numerics (f32 accumulation either way)."""
    x = input_list[-1]
    k = weight.shape[0]
    t_ = x.shape[-1]
    xp = jnp.pad(x, ((0, 0), (0, 0), (0, k - 1))).astype(operand_dtype)
    w = weight.astype(operand_dtype)
    out = jnp.zeros(x.shape, jnp.float32)
    for kk in range(k):
        out = out + jnp.einsum('oi,bit->bot', w[kk], xp[:, :, kk:kk + t_],
                               preferred_element_type=jnp.float32,
                               precision=jax.lax.Precision.HIGHEST)
    out = out + bias[None, :, :]
    out = jnp.maximum(out, 0.0)
    for xi in input_list:
        out = out + xi
    return out.astype(x.dtype)


if __name__ == "__main__":
    key = jax.random.PRNGKey(0)
    k_in0, k_in1 = jax.random.split(key, 2)
    # input_list[i] for i in range(node_index + 1); input_list[-1] feeds the main op
    input_list = [
        jax.random.normal(k_in0, (B, FILTERS, T), jnp.float32),
        jax.random.normal(k_in1, (B, FILTERS, T), jnp.float32),
    ]

    # deterministic synthetic parameters (Conv1d(filters, filters, kernel=5))
    pkey = jax.random.PRNGKey(42)
    kw, kb = jax.random.split(pkey, 2)
    # weight[k, c_out, c_in]  (PyTorch stores (c_out, c_in, k); tap-major here)
    weight = 0.1 * jax.random.normal(kw, (KERNEL, FILTERS, FILTERS), jnp.float32)
    bias = 0.1 * jax.random.normal(kb, (FILTERS, 1), jnp.float32)

    out = jax.block_until_ready(node_forward(input_list, weight, bias))
    assert out.shape == (B, FILTERS, T)

    # (a) bf16-operand reference: matches the kernel's MXU numerics -> tight check
    ref_bf16 = node_ref(input_list, weight, bias, operand_dtype=jnp.bfloat16)
    # (b) full-f32 reference: semantic check, tolerance loosened for bf16 operands
    ref_f32 = node_ref(input_list, weight, bias, operand_dtype=jnp.float32)

    err_bf16 = float(jnp.max(jnp.abs(out - ref_bf16)))
    err_f32 = float(jnp.max(jnp.abs(out - ref_f32)))
    assert jnp.allclose(out, ref_bf16, rtol=2e-3, atol=2e-3), \
        f"bf16-operand ref mismatch, max abs err {err_bf16}"
    assert jnp.allclose(out, ref_f32, rtol=5e-2, atol=5e-2), \
        f"f32 ref mismatch, max abs err {err_f32}"

    print("KERNEL_OK")
</pallas_src>

<mosaic_0001>
module attributes {stable_mosaic.version = 11 : i64} {
  func.func @_node_kernel(%arg0: memref<2x32x128xf32, #tpu.memory_space<vmem>>, %arg1: memref<2x32x128xf32, #tpu.memory_space<vmem>>, %arg2: memref<32x160xbf16, #tpu.memory_space<vmem>>, %arg3: memref<32x1xf32, #tpu.memory_space<vmem>>, %arg4: memref<2x32x128xf32, #tpu.memory_space<vmem>>, %arg5: memref<32x256xf32, #tpu.memory_space<vmem>>, %arg6: memref<160x256xbf16, #tpu.memory_space<vmem>>) attributes {dimension_semantics = [], scalar_prefetch = 0 : i64, scratch_operands = 2 : i64, tpu.core_type = #tpu.core_type<tc>} {
    %c0 = arith.constant 0 : index
    %c0_0 = arith.constant 0 : index
    %c0_1 = arith.constant 0 : index
    %0 = vector.load %arg0[%c0, %c0_0, %c0_1] : memref<2x32x128xf32, #tpu.memory_space<vmem>>, vector<1x32x128xf32>
    %1 = vector.shape_cast %0 : vector<1x32x128xf32> to vector<32x128xf32>
    %c0_2 = arith.constant 0 : index
    %c0_3 = arith.constant 0 : index
    %2 = vector.load %arg5[%c0_2, %c0_3] : memref<32x256xf32, #tpu.memory_space<vmem>>, vector<32x128xf32>
    tpu.vector_store %arg5[%c0_2, %c0_3], %1 {strides = array<i32>} : memref<32x256xf32, #tpu.memory_space<vmem>>, vector<32x128xf32>,
    %c1 = arith.constant 1 : index
    %c0_4 = arith.constant 0 : index
    %c0_5 = arith.constant 0 : index
    %3 = vector.load %arg0[%c1, %c0_4, %c0_5] : memref<2x32x128xf32, #tpu.memory_space<vmem>>, vector<1x32x128xf32>
    %4 = vector.shape_cast %3 : vector<1x32x128xf32> to vector<32x128xf32>
    %c0_6 = arith.constant 0 : index
    %c128 = arith.constant 128 : index
    %5 = vector.load %arg5[%c0_6, %c128] : memref<32x256xf32, #tpu.memory_space<vmem>>, vector<32x128xf32>
    tpu.vector_store %arg5[%c0_6, %c128], %4 {strides = array<i32>} : memref<32x256xf32, #tpu.memory_space<vmem>>, vector<32x128xf32>,
    %c0_7 = arith.constant 0 : index
    %c0_8 = arith.constant 0 : index
    %6 = vector.load %arg5[%c0_7, %c0_8] : memref<32x256xf32, #tpu.memory_space<vmem>>, vector<32x256xf32>
    %7 = tpu.iota {dimensions = array<i32: 1>} : vector<32x256xi32>
    %c128_i32 = arith.constant 128 : i32
    %c0_i32 = arith.constant 0 : i32
    %8 = arith.cmpi eq, %c128_i32, %c0_i32 : i32
    %c1_i32 = arith.constant 1 : i32
    %9 = arith.select %8, %c1_i32, %c128_i32 : i32
    %10 = vector.broadcast %9 : i32 to vector<32x256xi32>
    %11 = arith.remsi %7, %10 : vector<32x256xi32>
    %c0_i32_9 = arith.constant 0 : i32
    %12 = vector.broadcast %c0_i32_9 : i32 to vector<32x256xi32>
    %13 = arith.cmpi ne, %11, %12 : vector<32x256xi32>
    %c0_i32_10 = arith.constant 0 : i32
    %14 = vector.broadcast %c0_i32_10 : i32 to vector<32x256xi32>
    %15 = arith.cmpi slt, %11, %14 : vector<32x256xi32>
    %c0_i32_11 = arith.constant 0 : i32
    %16 = arith.cmpi slt, %9, %c0_i32_11 : i32
    %17 = vector.broadcast %16 : i1 to vector<32x256xi1>
    %18 = vector.broadcast %17 : vector<32x256xi1> to vector<32x256xi1>
    %19 = arith.xori %15, %18 : vector<32x256xi1>
    %20 = arith.andi %19, %13 : vector<32x256xi1>
    %21 = vector.broadcast %9 : i32 to vector<32x256xi32>
    %22 = arith.addi %11, %21 : vector<32x256xi32>
    %23 = arith.select %20, %22, %11 : vector<32x256xi1>, vector<32x256xi32>
    %24 = arith.truncf %6 : vector<32x256xf32> to vector<32x256xbf16>
    %c0_12 = arith.constant 0 : index
    %c0_13 = arith.constant 0 : index
    %25 = vector.load %arg6[%c0_12, %c0_13] : memref<160x256xbf16, #tpu.memory_space<vmem>>, vector<32x256xbf16>
    tpu.vector_store %arg6[%c0_12, %c0_13], %24 {strides = array<i32>} : memref<160x256xbf16, #tpu.memory_space<vmem>>, vector<32x256xbf16>,
    %c255_i32 = arith.constant 255 : i32
    %26 = tpu.dynamic_rotate %6 by %c255_i32 dim 1 : vector<32x256xf32>, i32 -> vector<32x256xf32>
    %c127_i32 = arith.constant 127 : i32
    %27 = vector.broadcast %c127_i32 : i32 to vector<32x256xi32>
    %28 = arith.cmpi slt, %23, %27 : vector<32x256xi32>
    %cst = arith.constant 0.000000e+00 : f32
    %29 = vector.broadcast %cst : f32 to vector<32x256xf32>
    %30 = arith.select %28, %26, %29 : vector<32x256xi1>, vector<32x256xf32>
    %31 = arith.truncf %30 : vector<32x256xf32> to vector<32x256xbf16>
    %c32 = arith.constant 32 : index
    %c0_14 = arith.constant 0 : index
    %32 = vector.load %arg6[%c32, %c0_14] : memref<160x256xbf16, #tpu.memory_space<vmem>>, vector<32x256xbf16>
    tpu.vector_store %arg6[%c32, %c0_14], %31 {strides = array<i32>} : memref<160x256xbf16, #tpu.memory_space<vmem>>, vector<32x256xbf16>,
    %c254_i32 = arith.constant 254 : i32
    %33 = tpu.dynamic_rotate %6 by %c254_i32 dim 1 : vector<32x256xf32>, i32 -> vector<32x256xf32>
    %c126_i32 = arith.constant 126 : i32
    %34 = vector.broadcast %c126_i32 : i32 to vector<32x256xi32>
    %35 = arith.cmpi slt, %23, %34 : vector<32x256xi32>
    %cst_15 = arith.constant 0.000000e+00 : f32
    %36 = vector.broadcast %cst_15 : f32 to vector<32x256xf32>
    %37 = arith.select %35, %33, %36 : vector<32x256xi1>, vector<32x256xf32>
    %38 = arith.truncf %37 : vector<32x256xf32> to vector<32x256xbf16>
    %c64 = arith.constant 64 : index
    %c0_16 = arith.constant 0 : index
    %39 = vector.load %arg6[%c64, %c0_16] : memref<160x256xbf16, #tpu.memory_space<vmem>>, vector<32x256xbf16>
    tpu.vector_store %arg6[%c64, %c0_16], %38 {strides = array<i32>} : memref<160x256xbf16, #tpu.memory_space<vmem>>, vector<32x256xbf16>,
    %c253_i32 = arith.constant 253 : i32
    %40 = tpu.dynamic_rotate %6 by %c253_i32 dim 1 : vector<32x256xf32>, i32 -> vector<32x256xf32>
    %c125_i32 = arith.constant 125 : i32
    %41 = vector.broadcast %c125_i32 : i32 to vector<32x256xi32>
    %42 = arith.cmpi slt, %23, %41 : vector<32x256xi32>
    %cst_17 = arith.constant 0.000000e+00 : f32
    %43 = vector.broadcast %cst_17 : f32 to vector<32x256xf32>
    %44 = arith.select %42, %40, %43 : vector<32x256xi1>, vector<32x256xf32>
    %45 = arith.truncf %44 : vector<32x256xf32> to vector<32x256xbf16>
    %c96 = arith.constant 96 : index
    %c0_18 = arith.constant 0 : index
    %46 = vector.load %arg6[%c96, %c0_18] : memref<160x256xbf16, #tpu.memory_space<vmem>>, vector<32x256xbf16>
    tpu.vector_store %arg6[%c96, %c0_18], %45 {strides = array<i32>} : memref<160x256xbf16, #tpu.memory_space<vmem>>, vector<32x256xbf16>,
    %c252_i32 = arith.constant 252 : i32
    %47 = tpu.dynamic_rotate %6 by %c252_i32 dim 1 : vector<32x256xf32>, i32 -> vector<32x256xf32>
    %c124_i32 = arith.constant 124 : i32
    %48 = vector.broadcast %c124_i32 : i32 to vector<32x256xi32>
    %49 = arith.cmpi slt, %23, %48 : vector<32x256xi32>
    %cst_19 = arith.constant 0.000000e+00 : f32
    %50 = vector.broadcast %cst_19 : f32 to vector<32x256xf32>
    %51 = arith.select %49, %47, %50 : vector<32x256xi1>, vector<32x256xf32>
    %52 = arith.truncf %51 : vector<32x256xf32> to vector<32x256xbf16>
    %c128_20 = arith.constant 128 : index
    %c0_21 = arith.constant 0 : index
    %53 = vector.load %arg6[%c128_20, %c0_21] : memref<160x256xbf16, #tpu.memory_space<vmem>>, vector<32x256xbf16>
    tpu.vector_store %arg6[%c128_20, %c0_21], %52 {strides = array<i32>} : memref<160x256xbf16, #tpu.memory_space<vmem>>, vector<32x256xbf16>,
    %c0_22 = arith.constant 0 : index
    %c0_23 = arith.constant 0 : index
    %54 = vector.load %arg2[%c0_22, %c0_23] : memref<32x160xbf16, #tpu.memory_space<vmem>>, vector<32x160xbf16>
    %c0_24 = arith.constant 0 : index
    %c0_25 = arith.constant 0 : index
    %55 = vector.load %arg6[%c0_24, %c0_25] : memref<160x256xbf16, #tpu.memory_space<vmem>>, vector<160x256xbf16>
    %cst_26 = arith.constant dense<0.000000e+00> : vector<32x256xf32>
    %56 = tpu.matmul %54, %55, %cst_26 {dimension_numbers = #tpu.dot_dimension_numbers<[1], [0], [0], [1], [0, 0, 1, 1], [], []>} : vector<32x160xbf16>, vector<160x256xbf16>, vector<32x256xf32> -> vector<32x256xf32>
    %c0_27 = arith.constant 0 : index
    %c0_28 = arith.constant 0 : index
    %57 = vector.load %arg3[%c0_27, %c0_28] : memref<32x1xf32, #tpu.memory_space<vmem>>, vector<32x1xf32>
    %58 = vector.broadcast %57 : vector<32x1xf32> to vector<32x256xf32>
    %59 = arith.addf %56, %58 : vector<32x256xf32>
    %cst_29 = arith.constant 0.000000e+00 : f32
    %60 = vector.broadcast %cst_29 : f32 to vector<32x256xf32>
    %61 = arith.maximumf %59, %60 : vector<32x256xf32>
    %62 = vector.extract_strided_slice %61 {offsets = [0, 0], sizes = [32, 128], strides = [1, 1]} : vector<32x256xf32> to vector<32x128xf32>
    %c0_30 = arith.constant 0 : index
    %c0_31 = arith.constant 0 : index
    %c0_32 = arith.constant 0 : index
    %63 = vector.load %arg0[%c0_30, %c0_31, %c0_32] : memref<2x32x128xf32, #tpu.memory_space<vmem>>, vector<1x32x128xf32>
    %64 = vector.shape_cast %63 : vector<1x32x128xf32> to vector<32x128xf32>
    %65 = arith.addf %62, %64 : vector<32x128xf32>
    %c0_33 = arith.constant 0 : index
    %c0_34 = arith.constant 0 : index
    %c0_35 = arith.constant 0 : index
    %66 = vector.load %arg1[%c0_33, %c0_34, %c0_35] : memref<2x32x128xf32, #tpu.memory_space<vmem>>, vector<1x32x128xf32>
    %67 = vector.shape_cast %66 : vector<1x32x128xf32> to vector<32x128xf32>
    %68 = arith.addf %65, %67 : vector<32x128xf32>
    %c0_36 = arith.constant 0 : index
    %c0_37 = arith.constant 0 : index
    %c0_38 = arith.constant 0 : index
    %69 = vector.load %arg4[%c0_36, %c0_37, %c0_38] : memref<2x32x128xf32, #tpu.memory_space<vmem>>, vector<1x32x128xf32>
    %70 = vector.shape_cast %69 : vector<1x32x128xf32> to vector<32x128xf32>
    %71 = vector.shape_cast %68 : vector<32x128xf32> to vector<1x32x128xf32>
    tpu.vector_store %arg4[%c0_36, %c0_37, %c0_38], %71 {strides = array<i32>} : memref<2x32x128xf32, #tpu.memory_space<vmem>>, vector<1x32x128xf32>,
    %72 = vector.extract_strided_slice %61 {offsets = [0, 128], sizes = [32, 128], strides = [1, 1]} : vector<32x256xf32> to vector<32x128xf32>
    %c1_39 = arith.constant 1 : index
    %c0_40 = arith.constant 0 : index
    %c0_41 = arith.constant 0 : index
    %73 = vector.load %arg0[%c1_39, %c0_40, %c0_41] : memref<2x32x128xf32, #tpu.memory_space<vmem>>, vector<1x32x128xf32>
    %74 = vector.shape_cast %73 : vector<1x32x128xf32> to vector<32x128xf32>
    %75 = arith.addf %72, %74 : vector<32x128xf32>
    %c1_42 = arith.constant 1 : index
    %c0_43 = arith.constant 0 : index
    %c0_44 = arith.constant 0 : index
    %76 = vector.load %arg1[%c1_42, %c0_43, %c0_44] : memref<2x32x128xf32, #tpu.memory_space<vmem>>, vector<1x32x128xf32>
    %77 = vector.shape_cast %76 : vector<1x32x128xf32> to vector<32x128xf32>
    %78 = arith.addf %75, %77 : vector<32x128xf32>
    %c1_45 = arith.constant 1 : index
    %c0_46 = arith.constant 0 : index
    %c0_47 = arith.constant 0 : index
    %79 = vector.load %arg4[%c1_45, %c0_46, %c0_47] : memref<2x32x128xf32, #tpu.memory_space<vmem>>, vector<1x32x128xf32>
    %80 = vector.shape_cast %79 : vector<1x32x128xf32> to vector<32x128xf32>
    %81 = vector.shape_cast %78 : vector<32x128xf32> to vector<1x32x128xf32>
    tpu.vector_store %arg4[%c1_45, %c0_46, %c0_47], %81 {strides = array<i32>} : memref<2x32x128xf32, #tpu.memory_space<vmem>>, vector<1x32x128xf32>,
    return
  }
}

</mosaic_0001>

<bundles_post_ra>
// kernel: tpu_custom_call.1
= control target key start
LH: loop header
LB: loop body
LE: loop exit
PB: predicated region body
PF: predicated region fallthrough
CT: control target
= control target key end

     0   :  { %9 = vsyncpa [#allocation5], 0  ;;  %s1034_s0 = inlined_call_operand.hbm [shape: f32[2,32,128], index: 0, kind: input, shape index: {}]   ;;  %s1035_s1 = inlined_call_operand.hbm [shape: f32[2,32,128], index: 1, kind: input, shape index: {}]   ;;  %s1036_s2 = inlined_call_operand.vmem [shape: bf16[32,160], index: 2, kind: input, shape index: {}]   ;;  %s1037_s3 = inlined_call_operand.vmem [shape: f32[32,1], index: 3, kind: input, shape index: {}]   ;;  %s1038_s4 = inlined_call_operand.hbm [shape: f32[2,32,128], index: 4, kind: output, shape index: {}]  }
   0x1   :  { %10 = vsyncpa [#allocation8], 0 }
   0x2   :  { %11 = vsyncpa [#allocation6], 0  ;;  %s717_s15 = smov [#allocation4]   ;;  %s645_s19 = scalar_lea.hbm %s1034_s0, 1024 }
   0x3   :  { %s17_s16 = sshll.u32 %s717_s15, 4  ;;  %p646_p0 = scmp.ne.s32.totalorder %s1034_s0, %s645_s19  ;;  %s18_s16 = int_to_ptr.vmem [resolvable:$true] %s17_s16 }
   0x4   :  { %p649_p1 = scmp.lt.u32.totalorder %s645_s19, %s1034_s0 }
   0x6   :  { %p651_p2 = pnand %p649_p1, %p646_p0 }
   0x8   :  { %654 = shalt.err (!%p651_p2)
}
   0x9   :  { %s655_s24 = scalar_lea.vmem %s18_s16, 1024  ;;  %p660_p4 = scmp.lt.s32.totalorder %s18_s16, %s18_s16 }
   0xa   :  { %p656_p3 = scmp.ne.s32.totalorder %s18_s16, %s655_s24  ;;  %p661_p5 = scmp.lt.s32.totalorder %s655_s24, %s655_s24 }
   0xc   :  { %p662_p6 = por %p661_p5, %p660_p4 }
   0xe   :  { %p663_p7 = pnand %p662_p6, %p656_p3 }
  0x10   :  { %666 = shalt.err (!%p663_p7)
}
  0x11   :  { %s718_s25 = smov 128   ;;  %s719_s26 = smov 8  }
  0x12   :  { %23 = dma.hbm_to_vmem [thread:$0]  %s1034_s0, 1024, %s18_s16, [#allocation5], %s718_s25, %s718_s25, %s719_s26  }
  0x13   :  { %s720_s29 = smov [#allocation7]   ;;  %s667_s7 = scalar_lea.hbm %s1035_s1, 1024 }
  0x14   :  { %s29_s30 = sshll.u32 %s720_s29, 4  ;;  %p668_p8 = scmp.ne.s32.totalorder %s1035_s1, %s667_s7  ;;  %s30_s30 = int_to_ptr.vmem [resolvable:$true] %s29_s30 }
  0x15   :  { %p671_p9 = scmp.lt.u32.totalorder %s667_s7, %s1035_s1 }
  0x17   :  { %p673_p10 = pnand %p671_p9, %p668_p8 }
  0x19   :  { %676 = shalt.err (!%p673_p10)
}
  0x1a   :  { %s677_s12 = scalar_lea.vmem %s30_s30, 1024  ;;  %p682_p12 = scmp.lt.s32.totalorder %s30_s30, %s30_s30 }
  0x1b   :  { %p678_p11 = scmp.ne.s32.totalorder %s30_s30, %s677_s12  ;;  %p683_p13 = scmp.lt.s32.totalorder %s677_s12, %s677_s12 }
  0x1d   :  { %p684_p0 = por %p683_p13, %p682_p12 }
  0x1f   :  { %p685_p1 = pnand %p684_p0, %p678_p11 }
  0x21   :  { %688 = shalt.err (!%p685_p1)
}
  0x22   :  { %35 = dma.hbm_to_vmem [thread:$0]  %s1035_s1, 1024, %s30_s30, [#allocation8], %s718_s25, %s718_s25, %s719_s26  }
  0x23   :  { %711 = dma.done.wait [#allocation5], 1024  }
  0x24   :  { %712 = vsyncadd [#allocation5], 4294966272 }
  0x25   :  { %713 = dma.done.wait [#allocation8], 1024  }
  0x26   :  { %714 = vsyncadd [#allocation8], 4294966272  ;;  %v782_v0 = vld [vmem:[#allocation4 + $0x10] sm:$0xff]  ;;  %v784_v1 = vld [vmem:[#allocation4 + $0x18] sm:$0xff]  ;;  %s721_s1 = smov 127   ;;  %s722_s14 = smov 126   ;;  %v72_v23 = vlaneseq }
  0x27   :  { %v786_v2 = vld [vmem:[#allocation4] sm:$0xff]  ;;  %v567_v3 = vpack.i.bf16 %v784_v1, %v782_v0  ;;  %v790_v4 = vld [vmem:[#allocation4 + $0x8] sm:$0xff]  ;;  %v792_v5 = vld [vmem:[#allocation4 + $0x30] sm:$0xff]  ;;  %v101_v15 = vpack.c.bf16 %v784_v1, %v782_v0  ;;  %s723_s15 = smov 125   ;;  %s724_s16 = smov 124   ;;  %vm345_vm0 = vcmask 261120  }
  0x28   :  { %v794_v6 = vld [vmem:[#allocation4 + $0x38] sm:$0xff]  ;;  %v557_v7 = vpack.i.bf16 %v790_v4, %v786_v2  ;;  %v798_v8 = vld [vmem:[#allocation4 + $0x20] sm:$0xff]  ;;  %v800_v9 = vld [vmem:[#allocation4 + $0x28] sm:$0xff]  ;;  %v99_v10 = vpack.c.bf16 %v790_v4, %v786_v2  ;;  %v725_v20 = vmov 0   ;;  %v832_v24 = vand.u32 127, %v72_v23 }
  0x29   :  { %568 = vrot.lane.b32.xlu1 %v567_v3, %s721_s1  ;;  %v572_v11 = vpack.i.bf16 %v794_v6, %v792_v5  ;;  %v100_v12 = vpack.c.bf16 %v800_v9, %v798_v8  ;;  %v102_v13 = vpack.c.bf16 %v794_v6, %v792_v5  ;;  %v562_v14 = vpack.i.bf16 %v800_v9, %v798_v8  ;;  %v641_v16 = vld [vmem:[%s1036_s2 + $0x4] ss:$8 sps:$4 sm:$0xff]   ;;  %v644_v17 = vld [vmem:[%s1036_s2 + $0x14] ss:$8 sps:$4 sm:$0xff]  }
  0x2a   :  { %558 = vrot.lane.b32.xlu0 %v557_v7, %s721_s1  ;;  %477 = vmatprep.mubr.msk.bf16.mxu0 %vm345_vm0, %v641_v16  ;;  %v304_v18 = vld [vmem:[%s1037_s3 + $0x8] sm:$0xff]  ;;  %v303_v19 = vld [vmem:[%s1037_s3] sm:$0xff]  ;;  %v305_v21 = vld [vmem:[%s1037_s3 + $0x10] sm:$0xff]  ;;  %v74_v25 = vadd.s32 128, %v832_v24  ;;  %vm123_vm1 = vcmp.lt.s32.totalorder %v832_v24, 127  ;;  %vm166_vm3 = vcmp.lt.s32.totalorder %v832_v24, 126 }
  0x2b   :  { %352 = vmatprep.subr.bf16.mxu0 %v100_v12  ;;  %527 = vmatprep.subr.bf16.mxu1 %v100_v12  ;;  %v306_v22 = vld [vmem:[%s1037_s3 + $0x18] sm:$0xff]  ;;  %vm859_vm5 = vmpackc.low %vm123_vm1, %vm123_vm1  ;;  %vm209_vm8 = vcmp.lt.s32.totalorder %v832_v24, 125  ;;  %vm252_vm12 = vcmp.lt.s32.totalorder %v832_v24, 124 }
  0x2c   :  { %353 = vmatpush1.bf16.msra.mxu0 %v99_v10  ;;  %537 = vmatpush1.bf16.msra.mxu1 %v99_v10  ;;  %v835_v28 = vand.u32 127, %v74_v25  ;;  %vm912_vm9 = vmpackc.low %vm166_vm3, %vm166_vm3 }
  0x2d   :  { %573 = vrot.lane.b32.xlu1 %v572_v11, %s721_s1  ;;  %354 = vmatprep.subr.bf16.mxu0 %v102_v13  ;;  %vm957_vm13 = vmpackc.low %vm209_vm8, %vm209_vm8 }
  0x2e   :  { %563 = vrot.lane.b32.xlu0 %v562_v14, %s721_s1  ;;  %528 = vmatprep.subr.bf16.mxu1 %v102_v13  ;;  %vm133_vm2 = vcmp.lt.s32.totalorder %v835_v28, 127  ;;  %vm176_vm6 = vcmp.lt.s32.totalorder %v835_v28, 126  ;;  %vm219_vm10 = vcmp.lt.s32.totalorder %v835_v28, 125  ;;  %vm262_vm14 = vcmp.lt.s32.totalorder %v835_v28, 124 }
  0x2f   :  { %478 = vmatprep.mubr.msk.bf16.mxu1 %vm345_vm0, %v644_v17  ;;  %638 = vset.pattern.permute.xlu1 %v725_v20  ;;  %vm852_vm4 = vmpackc.low %vm133_vm2, %vm133_vm2 }
  0x30   :  { %355 = vmatpush1.bf16.msra.mxu0 %v101_v15  ;;  %538 = vmatpush1.bf16.msra.mxu1 %v101_v15  ;;  %vm888_vm7 = vmpackc.low %vm176_vm6, %vm176_vm6 }
  0x31   :  { %583 = vrot.lane.b32.xlu1 %v562_v14, %s722_s14  ;;  %637 = vset.pattern.permute.xlu0 %v725_v20  ;;  %vm933_vm11 = vmpackc.low %vm219_vm10, %vm219_vm10 }
  0x32   :  { %578 = vrot.lane.b32.xlu0 %v557_v7, %s722_s14  ;;  %vm978_vm15 = vmpackc.low %vm262_vm14, %vm262_vm14 }
  0x33   :  { %vm518_vm0 = vmpackc.low %vm252_vm12, %vm252_vm12 }
  0x35   :  { %593 = vrot.lane.b32.xlu1 %v572_v11, %s722_s14 }
  0x36   :  { %588 = vrot.lane.b32.xlu0 %v567_v3, %s722_s14 }
  0x39   :  { %603 = vrot.lane.b32.xlu1 %v562_v14, %s723_s15 }
  0x3a   :  { %598 = vrot.lane.b32.xlu0 %v557_v7, %s723_s15 }
  0x3d   :  { %613 = vrot.lane.b32.xlu1 %v572_v11, %s723_s15 }
  0x3e   :  { %608 = vrot.lane.b32.xlu0 %v567_v3, %s723_s15 }
  0x41   :  { %623 = vrot.lane.b32.xlu1 %v562_v14, %s724_s16 }
  0x42   :  { %618 = vrot.lane.b32.xlu0 %v557_v7, %s724_s16 }
  0x45   :  { %633 = vrot.lane.b32.xlu1 %v572_v11, %s724_s16 }
  0x46   :  { %628 = vrot.lane.b32.xlu0 %v567_v3, %s724_s16 }
  0x49   :  { %314 = vperm.xlu1 %638, %v304_v18  }
  0x4a   :  { %309 = vperm.xlu0 %637, %v303_v19  }
  0x4d   :  { %319 = vperm.xlu1 %638, %v305_v21  }
  0x4e   :  { %324 = vperm.xlu0 %637, %v306_v22  }
  0x9b   :  { %v569_v26 = vpop.permute.xlu1 %568 }
  0x9c   :  { %v559_v27 = vpop.permute.xlu0 %558  ;;  %v571_v29 = vunpack.i.h.bf16 %v569_v26  ;;  %v570_v30 = vunpack.i.l.bf16 %v569_v26 }
  0x9d   :  { %v561_v35 = vunpack.i.h.bf16 %v559_v27  ;;  %v560_v36 = vunpack.i.l.bf16 %v559_v27 }
  0x9f   :  { %v574_v31 = vpop.permute.xlu1 %573 }
  0xa0   :  { %v576_v32 = vunpack.i.h.bf16 %v574_v31  ;;  %v575_v33 = vunpack.i.l.bf16 %v574_v31  ;;  %v564_v34 = vpop.permute.xlu0 %563 }
  0xa1   :  { %v566_v37 = vunpack.i.h.bf16 %v564_v34  ;;  %v565_v38 = vunpack.i.l.bf16 %v564_v34 }
  0xa2   :  { %v130_v39 = vsel %vm123_vm1, %v575_v33, %v570_v30  ;;  %v131_v40 = vsel %vm123_vm1, %v576_v32, %v571_v29  ;;  %v126_v55 = vsel %vm123_vm1, %v570_v30, %v575_v33  ;;  %v127_v56 = vsel %vm123_vm1, %v571_v29, %v576_v32 }
  0xa3   :  { %v124_v41 = vsel %vm123_vm1, %v560_v36, %v565_v38  ;;  %v125_v42 = vsel %vm123_vm1, %v561_v35, %v566_v37  ;;  %v584_v43 = vpop.permute.xlu1 %583  ;;  %v128_v44 = vsel %vm123_vm1, %v565_v38, %v560_v36  ;;  %v129_v45 = vsel %vm123_vm1, %v566_v37, %v561_v35 }
  0xa4   :  { %v483_v46 = vpack.c.bf16 %v125_v42, %v124_v41  ;;  %v586_v48 = vunpack.i.h.bf16 %v584_v43  ;;  %v579_v49 = vpop.permute.xlu0 %578  ;;  %v480_v50 = vpack.c.bf16 %v129_v45, %v128_v44  ;;  %v585_v52 = vunpack.i.l.bf16 %v584_v43  ;;  %v421_v42 = vld [vmem:[#allocation7] sm:$0xff] }
  0xa5   :  { %v581_v53 = vunpack.i.h.bf16 %v579_v49  ;;  %v580_v54 = vunpack.i.l.bf16 %v579_v49  ;;  %v486_v57 = vpack.c.bf16 %v131_v40, %v130_v39  ;;  %v489_v13 = vpack.c.bf16 %v127_v56, %v126_v55 }
  0xa6   :  { %481 = vmatprep.subr.msk.bf16.mxu0 %vm852_vm4, %v480_v50  ;;  %529 = vmatprep.subr.msk.bf16.mxu1 %vm852_vm4, %v480_v50 }
  0xa7   :  { %v172_v58 = vsel %vm166_vm3, %v586_v48, %v581_v53  ;;  %v594_v59 = vpop.permute.xlu1 %593  ;;  %484 = vmatpush1.bf16.msk.msra.mxu0 %vm859_vm5, %v483_v46  ;;  %539 = vmatpush1.bf16.msk.msra.mxu1 %vm859_vm5, %v483_v46  ;;  %v168_v60 = vsel %vm166_vm3, %v581_v53, %v586_v48  ;;  %v171_v61 = vsel %vm166_vm3, %v585_v52, %v580_v54 }
  0xa8   :  { %v596_v62 = vunpack.i.h.bf16 %v594_v59  ;;  %v595_v63 = vunpack.i.l.bf16 %v594_v59  ;;  %v589_v3 = vpop.permute.xlu0 %588  ;;  %v167_v7 = vsel %vm166_vm3, %v580_v54, %v585_v52  ;;  %v492_v10 = vpack.c.bf16 %v172_v58, %v171_v61  ;;  %487 = vmatprep.subr.msk.bf16.mxu0 %vm852_vm4, %v486_v57  ;;  %530 = vmatprep.subr.msk.bf16.mxu1 %vm852_vm4, %v486_v57 }
  0xa9   :  { %v591_v11 = vunpack.i.h.bf16 %v589_v3  ;;  %v590_v12 = vunpack.i.l.bf16 %v589_v3  ;;  %v495_v18 = vpack.c.bf16 %v168_v60, %v167_v7 }
  0xab   :  { %v174_v15 = vsel %vm166_vm3, %v596_v62, %v591_v11  ;;  %v173_v16 = vsel %vm166_vm3, %v595_v63, %v590_v12  ;;  %v604_v17 = vpop.permute.xlu1 %603  ;;  %490 = vmatpush1.bf16.msk.msra.mxu0 %vm859_vm5, %v489_v13  ;;  %540 = vmatpush1.bf16.msk.msra.mxu1 %vm859_vm5, %v489_v13  ;;  %v170_v19 = vsel %vm166_vm3, %v591_v11, %v596_v62 }
  0xac   :  { %v606_v20 = vunpack.i.h.bf16 %v604_v17  ;;  %v605_v21 = vunpack.i.l.bf16 %v604_v17  ;;  %v599_v22 = vpop.permute.xlu0 %598  ;;  %v169_v23 = vsel %vm166_vm3, %v590_v12, %v595_v63  ;;  %v498_v25 = vpack.c.bf16 %v174_v15, %v173_v16  ;;  %493 = vmatprep.subr.msk.bf16.mxu0 %vm888_vm7, %v492_v10  ;;  %531 = vmatprep.subr.msk.bf16.mxu1 %vm888_vm7, %v492_v10 }
  0xad   :  { %v601_v27 = vunpack.i.h.bf16 %v599_v22  ;;  %v600_v29 = vunpack.i.l.bf16 %v599_v22  ;;  %v501_v33 = vpack.c.bf16 %v170_v19, %v169_v23  ;;  %v639_v19 = vld [vmem:[%s1036_s2] ss:$8 sps:$4 sm:$0xff]  }
  0xaf   :  { %v215_v30 = vsel %vm209_vm8, %v606_v20, %v601_v27  ;;  %v214_v31 = vsel %vm209_vm8, %v605_v21, %v600_v29  ;;  %v614_v32 = vpop.permute.xlu1 %613  ;;  %496 = vmatpush1.bf16.msk.msra.mxu0 %vm912_vm9, %v495_v18  ;;  %541 = vmatpush1.bf16.msk.msra.mxu1 %vm912_vm9, %v495_v18  ;;  %v211_v34 = vsel %vm209_vm8, %v601_v27, %v606_v20  ;;  %v642_v20 = vld [vmem:[%s1036_s2 + $0x10] ss:$8 sps:$4 sm:$0xff]   ;;  %s726_s2 = smov [#allocation9]  }
  0xb0   :  { %v616_v35 = vunpack.i.h.bf16 %v614_v32  ;;  %v615_v36 = vunpack.i.l.bf16 %v614_v32  ;;  %v609_v37 = vpop.permute.xlu0 %608  ;;  %v210_v38 = vsel %vm209_vm8, %v600_v29, %v605_v21  ;;  %v504_v39 = vpack.c.bf16 %v215_v30, %v214_v31  ;;  %499 = vmatprep.subr.msk.bf16.mxu0 %vm888_vm7, %v498_v25  ;;  %532 = vmatprep.subr.msk.bf16.mxu1 %vm888_vm7, %v498_v25  ;;  %s460_s8 = sshll.u32 %s726_s2, 4  ;;  %s461_s8 = int_to_ptr.vmem [resolvable:$true] %s460_s8 }
  0xb1   :  { %v611_v40 = vunpack.i.h.bf16 %v609_v37  ;;  %v610_v41 = vunpack.i.l.bf16 %v609_v37  ;;  %v507_v46 = vpack.c.bf16 %v211_v34, %v210_v38  ;;  %s689_s9 = scalar_lea.vmem %s461_s8, 1024  ;;  %p694_p3 = scmp.lt.s32.totalorder %s461_s8, %s461_s8 }
  0xb2   :  { %p690_p2 = scmp.ne.s32.totalorder %s461_s8, %s689_s9  ;;  %p695_p4 = scmp.lt.s32.totalorder %s689_s9, %s689_s9 }
  0xb3   :  { %v217_v43 = vsel %vm209_vm8, %v616_v35, %v611_v40  ;;  %v216_v44 = vsel %vm209_vm8, %v615_v36, %v610_v41  ;;  %v624_v45 = vpop.permute.xlu1 %623  ;;  %502 = vmatpush1.bf16.msk.msra.mxu0 %vm912_vm9, %v501_v33  ;;  %542 = vmatpush1.bf16.msk.msra.mxu1 %vm912_vm9, %v501_v33  ;;  %v213_v47 = vsel %vm209_vm8, %v611_v40, %v616_v35 }
  0xb4   :  { %v626_v48 = vunpack.i.h.bf16 %v624_v45  ;;  %v625_v49 = vunpack.i.l.bf16 %v624_v45  ;;  %v619_v50 = vpop.permute.xlu0 %618  ;;  %v212_v51 = vsel %vm209_vm8, %v610_v41, %v615_v36  ;;  %v510_v52 = vpack.c.bf16 %v217_v43, %v216_v44  ;;  %505 = vmatprep.subr.msk.bf16.mxu0 %vm933_vm11, %v504_v39  ;;  %533 = vmatprep.subr.msk.bf16.mxu1 %vm933_vm11, %v504_v39  ;;  %v423_v43 = vld [vmem:[#allocation7 + $0x10] sm:$0xff]  ;;  %p696_p5 = por %p695_p4, %p694_p3 }
  0xb5   :  { %v621_v54 = vunpack.i.h.bf16 %v619_v50  ;;  %v620_v55 = vunpack.i.l.bf16 %v619_v50  ;;  %v513_v59 = vpack.c.bf16 %v213_v47, %v212_v51  ;;  %v442_v50 = vld [vmem:[#allocation7 + $0x20] sm:$0xff]  ;;  %v444_v51 = vld [vmem:[#allocation7 + $0x30] sm:$0xff] }
  0xb6   :  { %p697_p6 = pnand %p696_p5, %p690_p2 }
  0xb7   :  { %v258_v56 = vsel %vm252_vm12, %v626_v48, %v621_v54  ;;  %v257_v57 = vsel %vm252_vm12, %v625_v49, %v620_v55  ;;  %v634_v58 = vpop.permute.xlu1 %633  ;;  %508 = vmatpush1.bf16.msk.msra.mxu0 %vm957_vm13, %v507_v46  ;;  %543 = vmatpush1.bf16.msk.msra.mxu1 %vm957_vm13, %v507_v46  ;;  %v254_v60 = vsel %vm252_vm12, %v621_v54, %v626_v48 }
  0xb8   :  { %v636_v61 = vunpack.i.h.bf16 %v634_v58  ;;  %v635_v62 = vunpack.i.l.bf16 %v634_v58  ;;  %v629_v63 = vpop.permute.xlu0 %628  ;;  %v253_v3 = vsel %vm252_vm12, %v620_v55, %v625_v49  ;;  %v516_v7 = vpack.c.bf16 %v258_v56, %v257_v57  ;;  %511 = vmatprep.subr.msk.bf16.mxu0 %vm933_vm11, %v510_v52  ;;  %534 = vmatprep.subr.msk.bf16.mxu1 %vm933_vm11, %v510_v52  ;;  %v422_v56 = vld [vmem:[#allocation7 + $0x8] sm:$0xff]  ;;  %v424_v57 = vld [vmem:[#allocation7 + $0x18] sm:$0xff] }
  0xb9   :  { %v631_v28 = vunpack.i.h.bf16 %v629_v63  ;;  %v630_v10 = vunpack.i.l.bf16 %v629_v63  ;;  %v519_v14 = vpack.c.bf16 %v254_v60, %v253_v3  ;;  %v443_v63 = vld [vmem:[#allocation7 + $0x28] sm:$0xff] }
  0xbb   :  { %v260_v12 = vsel %vm252_vm12, %v636_v61, %v631_v28  ;;  %v259_v13 = vsel %vm252_vm12, %v635_v62, %v630_v10  ;;  %514 = vmatpush1.bf16.msk.msra.mxu0 %vm957_vm13, %v513_v59  ;;  %544 = vmatpush1.bf16.msk.msra.mxu1 %vm957_vm13, %v513_v59  ;;  %v256_v15 = vsel %vm252_vm12, %v631_v28, %v636_v61 }
  0xbc   :  { %v255_v16 = vsel %vm252_vm12, %v630_v10, %v635_v62  ;;  %v522_v17 = vpack.c.bf16 %v260_v12, %v259_v13  ;;  %517 = vmatprep.subr.msk.bf16.mxu0 %vm978_vm15, %v516_v7  ;;  %535 = vmatprep.subr.msk.bf16.mxu1 %vm978_vm15, %v516_v7 }
  0xbd   :  { %v525_v18 = vpack.c.bf16 %v256_v15, %v255_v16 }
  0xbf   :  { %520 = vmatpush1.bf16.msk.msra.mxu0 %vm518_vm0, %v519_v14  ;;  %545 = vmatpush1.bf16.msk.msra.mxu1 %vm518_vm0, %v519_v14 }
  0xc0   :  { %523 = vmatprep.subr.msk.bf16.mxu0 %vm978_vm15, %v522_v17  ;;  %536 = vmatprep.subr.msk.bf16.mxu1 %vm978_vm15, %v522_v17 }
  0xc3   :  { %526 = vmatpush1.bf16.msk.msra.mxu0 %vm518_vm0, %v525_v18  ;;  %546 = vmatpush1.bf16.msk.msra.mxu1 %vm518_vm0, %v525_v18 }
  0xc6   :  { %385 = vmatmul.mubr.bf16.vlgmr.msra.gmra.mrb[0].mxu0 %v639_v19  ;;  %395 = vmatmul.mubr.bf16.vlgmr.msra.gmra.mrb[0].mxu1 %v642_v20 }
  0xc8   :  { %v315_v24 = vpop.permute.xlu1 %314 }
  0xc9   :  { %v310_v21 = vpop.permute.xlu0 %309 }
  0xcc   :  { %v320_v22 = vpop.permute.xlu1 %319 }
  0xcd   :  { %v325_v23 = vpop.permute.xlu0 %324 }
 0x199   :  { %v386_v25 = vpop.f32.mrb[0].mxu0  ;;  %v396_v26 = vpop.f32.mrb[0].mxu1 }
 0x19a   :  { %v387_v27 = vadd.f32 %v386_v25, %v310_v21  ;;  %v397_v29 = vadd.f32 %v396_v26, %v320_v22  ;;  %v388_v30 = vpop.f32.mrb[1].mxu0  ;;  %v398_v31 = vpop.f32.mrb[1].mxu1 }
 0x19b   :  { %v389_v32 = vadd.f32 %v388_v30, %v310_v21  ;;  %v399_v33 = vadd.f32 %v398_v31, %v320_v22  ;;  %v390_v34 = vpop.f32.mrb[2].mxu0  ;;  %v400_v35 = vpop.f32.mrb[2].mxu1 }
 0x19c   :  { %v405_v36 = vmax.f32 %v387_v27, 0.0  ;;  %v409_v37 = vmax.f32 %v397_v29, 0.0  ;;  %v391_v38 = vadd.f32 %v390_v34, %v315_v24  ;;  %v401_v39 = vadd.f32 %v400_v35, %v325_v23  ;;  %v392_v40 = vpop.f32.mrb[3].mxu0  ;;  %v402_v41 = vpop.f32.mrb[3].mxu1 }
 0x19d   :  { %v406_v44 = vmax.f32 %v389_v32, 0.0  ;;  %v410_v45 = vmax.f32 %v399_v33, 0.0  ;;  %v393_v46 = vadd.f32 %v392_v40, %v315_v24  ;;  %v403_v47 = vadd.f32 %v402_v41, %v325_v23 }
 0x19e   :  { %v417_v48 = vadd.f32 %v405_v36, %v786_v2  ;;  %v419_v49 = vadd.f32 %v409_v37, %v782_v0  ;;  %v407_v52 = vmax.f32 %v391_v38, 0.0  ;;  %v411_v53 = vmax.f32 %v401_v39, 0.0  ;;  %v445_v0 = vld [vmem:[#allocation7 + $0x38] sm:$0xff] }
 0x19f   :  { %v437_v54 = vadd.f32 %v406_v44, %v798_v8  ;;  %v439_v55 = vadd.f32 %v410_v45, %v792_v5  ;;  %v408_v58 = vmax.f32 %v393_v46, 0.0  ;;  %v412_v59 = vmax.f32 %v403_v47, 0.0 }
 0x1a0   :  { %v425_v60 = vadd.f32 %v421_v42, %v417_v48  ;;  %v427_v61 = vadd.f32 %v423_v43, %v419_v49  ;;  %v418_v62 = vadd.f32 %v407_v52, %v790_v4  ;;  %v420_v2 = vadd.f32 %v411_v53, %v784_v1 }
 0x1a1   :  { %v446_v3 = vadd.f32 %v442_v50, %v437_v54  ;;  %v448_v7 = vadd.f32 %v444_v51, %v439_v55  ;;  %v438_v8 = vadd.f32 %v408_v58, %v800_v9  ;;  %v440_v5 = vadd.f32 %v412_v59, %v794_v6 }
 0x1a2   :  { %429 = vst [vmem:[#allocation9] sm:$0xff] %v425_v60  ;;  %431 = vst [vmem:[#allocation9 + $0x10] sm:$0xff] %v427_v61  ;;  %v426_v28 = vadd.f32 %v422_v56, %v418_v62  ;;  %v428_v10 = vadd.f32 %v424_v57, %v420_v2 }
 0x1a3   :  { %451 = vst [vmem:[#allocation9 + $0x20] sm:$0xff] %v446_v3  ;;  %453 = vst [vmem:[#allocation9 + $0x30] sm:$0xff] %v448_v7  ;;  %v447_v11 = vadd.f32 %v443_v63, %v438_v8  ;;  %v449_v4 = vadd.f32 %v445_v0, %v440_v5 }
 0x1a4   :  { %430 = vst [vmem:[#allocation9 + $0x8] sm:$0xff] %v426_v28  ;;  %432 = vst [vmem:[#allocation9 + $0x18] sm:$0xff] %v428_v10 }
 0x1a5   :  { %452 = vst [vmem:[#allocation9 + $0x28] sm:$0xff] %v447_v11  ;;  %454 = vst [vmem:[#allocation9 + $0x38] sm:$0xff] %v449_v4 }
 0x1a6   :  { %700 = shalt.err (!%p697_p6)
}
 0x1a7   :  { %s701_s12 = scalar_lea.hbm %s1038_s4, 1024 }
 0x1a8   :  { %p702_p7 = scmp.ne.s32.totalorder %s1038_s4, %s701_s12  ;;  %p705_p8 = scmp.lt.u32.totalorder %s701_s12, %s1038_s4 }
 0x1aa   :  { %p707_p9 = pnand %p705_p8, %p702_p7 }
 0x1ac   :  { %710 = shalt.err (!%p707_p9)
}
 0x1ad   :  { %466 = dma.vmem_to_hbm [thread:$0]  %s461_s8, 1024, %s1038_s4, [#allocation6], %s718_s25, %s718_s25, %s719_s26  }
 0x1ae   :  { %715 = dma.done.wait [#allocation6], 1024  }
 0x1af   :  { %716 = vsyncadd [#allocation6], 4294966272 }
 0x1b0   :  { %470 = vsyncpa [#allocation5], 1 }
 0x1b1   :  { %471 = vsyncpa [#allocation8], 1 }
 0x1b2   :  { %472 = vsyncpa [#allocation6], 1 }

</bundles_post_ra>
